<compile_context>
chip_gen: v5e
topology: v5e:2x2
jax: 0.10.0
libtpu: 0.0.40
codegen_flags: <defaults>
</compile_context>

<pallas_src>
import jax
import jax.numpy as jnp
from jax.experimental import pallas as pl
from jax.experimental.pallas import tpu as pltpu


def _linear_kernel(x_ref, w_ref, b_ref, o_ref, acc_ref):
    """One (TM, N_pad) output tile; the feature (K) axis is the last grid axis."""
    k = pl.program_id(1)

    @pl.when(k == 0)
    def _():
        acc_ref[...] = jnp.zeros_like(acc_ref)

    acc_ref[...] += jnp.dot(x_ref[...], w_ref[...],
                            preferred_element_type=jnp.float32)

    @pl.when(k == pl.num_programs(1) - 1)
    def _():
        o_ref[...] = (acc_ref[...] + b_ref[...]).astype(o_ref.dtype)


def _round_up(x, m):
    return ((x + m - 1) // m) * m


def _vmem_plan():
    """Generation-aware scoped-VMEM target.

    v5e/v6e: 128 MiB physical (16/32 MiB scoped default -> must raise it),
    v7x: 64 MiB physical.  Use half of physical for this kernel's window and
    keep 8 MiB headroom for compiler scratch when sizing tiles.
    """
    cap = 64 * 1024 * 1024                      # conservative fallback (v7x physical)
    try:
        cap = int(pltpu.get_tpu_info().vmem_capacity_bytes)
    except Exception:
        pass
    vmem_limit = min(cap // 2, 100 * 1024 * 1024)
    budget = max(8 * 1024 * 1024, vmem_limit - 8 * 1024 * 1024)
    return vmem_limit, budget


def _choose_tk(dim, n_pad, itemsize, budget):
    """Feature-axis tile.  Single K step for typical classifier-head dims."""
    if dim <= 128 or 2 * dim * n_pad * itemsize <= budget // 2:
        return dim
    cap = (budget // 2) // (2 * n_pad * itemsize)
    cap = max(128, (cap // 128) * 128)
    # Prefer a lane-aligned tk that divides D exactly (avoids a per-call x pad).
    for tk in range(cap, 127, -128):
        if dim % tk == 0:
            return tk
    return cap


def _choose_tm(batch, tk, n_pad, in_itemsize, out_itemsize, budget):
    """Batch-axis tile sized against the double-buffered VMEM footprint."""
    if batch <= 8:
        return batch                            # single block == full (tiny) batch
    # per-row bytes: 2x x tile + 2x out tile + f32 accumulator scratch
    per_row = 2 * tk * in_itemsize + 2 * n_pad * out_itemsize + n_pad * 4
    fixed = 2 * tk * n_pad * in_itemsize + 2 * n_pad * 4      # W + bias buffers
    tm = max(8, (budget - fixed) // per_row)
    tm = min(int(tm), 2048)                     # raised cap (v5e/v6e 128 MiB VMEM)
    tm = max(8, (tm // 8) * 8)
    # v7x megacore: guarantee >= 2 roughly balanced grid steps on the
    # "parallel" batch axis so both TensorCores get work.
    tm = min(tm, _round_up(pl.cdiv(batch, 2), 8))
    return int(tm)


class LinearClassifier:
    """Pallas-TPU equivalent of the PyTorch LinearClassifier (forward only).

    All weight/bias layout transforms (transpose, 128-lane padding, optional
    bf16 cast) are done ONCE here instead of on every forward call.
    """

    def __init__(self, weight, bias, compute_dtype=None):
        num_labels, dim = weight.shape
        self.num_labels = int(num_labels)
        self.dim = int(dim)
        self.compute_dtype = (jnp.dtype(compute_dtype) if compute_dtype is not None
                              else jnp.dtype(weight.dtype))
        self.vmem_limit, self._budget = _vmem_plan()

        itemsize = self.compute_dtype.itemsize
        # Lane-dense output: pad num_labels to a multiple of 128 (sliced off later).
        self.n_pad = max(128, _round_up(self.num_labels, 128))
        # Feature (K) tiling plan; k_pad == dim on the common single-step path.
        self.tk = _choose_tk(self.dim, self.n_pad, itemsize, self._budget)
        self.k_pad = _round_up(self.dim, self.tk)

        # W^T zero-padded to (k_pad, n_pad); bias as (1, n_pad) f32 (f32 epilogue).
        w_t = jnp.zeros((self.k_pad, self.n_pad), dtype=self.compute_dtype)
        self.w_t = w_t.at[:self.dim, :self.num_labels].set(
            weight.T.astype(self.compute_dtype))
        b2d = jnp.zeros((1, self.n_pad), dtype=jnp.float32)
        self.b2d = b2d.at[:, :self.num_labels].set(bias.astype(jnp.float32))

    def __call__(self, x):
        batch = x.shape[0]
        out_dtype = x.dtype                          # nn.Linear: output follows input dtype
        x2d = x.reshape(batch, -1)                   # x.view(x.size(0), -1)
        assert x2d.shape[1] == self.dim
        x2d = x2d.astype(self.compute_dtype)         # no-op on the default (f32) path
        if self.k_pad != self.dim:
            # Rare huge-D path only (tk does not divide D); typical heads skip this.
            x2d = jnp.pad(x2d, ((0, 0), (0, self.k_pad - self.dim)))

        in_itemsize = self.compute_dtype.itemsize
        out_itemsize = in_itemsize                   # kernel writes in compute dtype
        tm = _choose_tm(batch, self.tk, self.n_pad, in_itemsize, out_itemsize,
                        self._budget)
        grid = (pl.cdiv(batch, tm), self.k_pad // self.tk)

        w_passes = grid[0] if grid[1] > 1 else 1
        cost = pl.CostEstimate(
            flops=2 * batch * self.k_pad * self.n_pad,
            transcendentals=0,
            bytes_accessed=(batch * self.k_pad * in_itemsize
                            + w_passes * self.k_pad * self.n_pad * in_itemsize
                            + batch * self.n_pad * out_itemsize),
        )

        out = pl.pallas_call(
            _linear_kernel,
            out_shape=jax.ShapeDtypeStruct((batch, self.n_pad), self.compute_dtype),
            grid_spec=pltpu.PrefetchScalarGridSpec(
                num_scalar_prefetch=0,
                grid=grid,
                in_specs=[
                    pl.BlockSpec((tm, self.tk), lambda i, k: (i, k)),        # x tile
                    pl.BlockSpec((self.tk, self.n_pad), lambda i, k: (k, 0)),  # W^T tile
                    pl.BlockSpec((1, self.n_pad), lambda i, k: (0, 0)),       # bias
                ],
                out_specs=pl.BlockSpec((tm, self.n_pad), lambda i, k: (i, 0)),
                scratch_shapes=[pltpu.VMEM((tm, self.n_pad), jnp.float32)],   # f32 acc
            ),
            compiler_params=pltpu.CompilerParams(
                dimension_semantics=("parallel", "arbitrary"),
                vmem_limit_bytes=self.vmem_limit,
            ),
            cost_estimate=cost,
        )(x2d, self.w_t, self.b2d)

        # Slice off lane padding; tiny cast back to the caller's dtype.
        return out[:, :self.num_labels].astype(out_dtype)


if __name__ == "__main__":
    key = jax.random.PRNGKey(0)
    k_x, k_w = jax.random.split(key)

    # Frozen-feature input: (batch=2, channels=4, h=4, w=2) -> dim = 32
    batch, C, H, W = 2, 4, 4, 2
    dim = C * H * W
    num_labels = 10

    x = jax.random.normal(k_x, (batch, C, H, W), dtype=jnp.float32)
    # Deterministic init matching the module: weight ~ N(0, 0.01), bias = 0
    weight = 0.01 * jax.random.normal(k_w, (num_labels, dim), dtype=jnp.float32)
    bias = jnp.zeros((num_labels,), dtype=jnp.float32)

    y_ref = x.reshape(batch, -1) @ weight.T + bias

    # Default path: same dtype/numerics as the PyTorch module (f32).
    clf = LinearClassifier(weight, bias)
    y = clf(x)
    jax.block_until_ready(y)
    assert y.shape == (batch, num_labels)
    assert y.dtype == x.dtype
    assert jnp.allclose(y, y_ref, atol=1e-5, rtol=1e-5)

    # Optional bf16 compute path (halves the dominant HBM stream); f32 MXU accumulation.
    clf_bf16 = LinearClassifier(weight, bias, compute_dtype=jnp.bfloat16)
    y_bf16 = clf_bf16(x)
    jax.block_until_ready(y_bf16)
    assert jnp.allclose(y_bf16, y_ref, atol=2e-2, rtol=2e-2)

    print("KERNEL_OK")
</pallas_src>

<mosaic_0001>
module attributes {stable_mosaic.version = 11 : i64} {
  func.func @_linear_kernel(%arg0: i32, %arg1: i32, %arg2: memref<2x32xf32, #tpu.memory_space<vmem>>, %arg3: memref<32x128xf32, #tpu.memory_space<vmem>>, %arg4: memref<1x128xf32, #tpu.memory_space<vmem>>, %arg5: memref<2x128xf32, #tpu.memory_space<vmem>>, %arg6: memref<2x128xf32, #tpu.memory_space<vmem>>) attributes {dimension_semantics = [#tpu.dimension_semantics<parallel>, #tpu.dimension_semantics<arbitrary>], iteration_bounds = array<i64: 1, 1>, scalar_prefetch = 0 : i64, scratch_operands = 1 : i64, tpu.core_type = #tpu.core_type<tc>, window_params = [{transform_indices = @transform_0, window_bounds = array<i64: 2, 32>}, {transform_indices = @transform_1, window_bounds = array<i64: 32, 128>}, {pipeline_mode = #tpu.pipeline_mode<synchronous>, transform_indices = @transform_2, window_bounds = array<i64: 1, 128>}, {transform_indices = @transform_3, window_bounds = array<i64: 2, 128>}]} {
    %c0_i32 = arith.constant 0 : i32
    %0 = arith.cmpi eq, %arg1, %c0_i32 : i32
    %1 = arith.extui %0 : i1 to i32
    %c0_i32_0 = arith.constant 0 : i32
    %2 = arith.cmpi ne, %1, %c0_i32_0 : i32
    scf.if %2 {
      %cst_10 = arith.constant 0.000000e+00 : f32
      %12 = vector.broadcast %cst_10 : f32 to vector<2x128xf32>
      %c0_11 = arith.constant 0 : index
      %c0_12 = arith.constant 0 : index
      %13 = vector.load %arg6[%c0_11, %c0_12] : memref<2x128xf32, #tpu.memory_space<vmem>>, vector<2x128xf32>
      tpu.vector_store %arg6[%c0_11, %c0_12], %12 {strides = array<i32>} : memref<2x128xf32, #tpu.memory_space<vmem>>, vector<2x128xf32>,
    } else {
    }
    %c0 = arith.constant 0 : index
    %c0_1 = arith.constant 0 : index
    %3 = vector.load %arg6[%c0, %c0_1] : memref<2x128xf32, #tpu.memory_space<vmem>>, vector<2x128xf32>
    %c0_2 = arith.constant 0 : index
    %c0_3 = arith.constant 0 : index
    %4 = vector.load %arg2[%c0_2, %c0_3] : memref<2x32xf32, #tpu.memory_space<vmem>>, vector<2x32xf32>
    %c0_4 = arith.constant 0 : index
    %c0_5 = arith.constant 0 : index
    %5 = vector.load %arg3[%c0_4, %c0_5] : memref<32x128xf32, #tpu.memory_space<vmem>>, vector<32x128xf32>
    %cst = arith.constant dense<0.000000e+00> : vector<2x128xf32>
    %6 = tpu.matmul %4, %5, %cst {dimension_numbers = #tpu.dot_dimension_numbers<[1], [0], [0], [1], [0, 0, 1, 1], [], []>} : vector<2x32xf32>, vector<32x128xf32>, vector<2x128xf32> -> vector<2x128xf32>
    %7 = arith.addf %3, %6 : vector<2x128xf32>
    %c0_6 = arith.constant 0 : index
    %c0_7 = arith.constant 0 : index
    %8 = vector.load %arg6[%c0_6, %c0_7] : memref<2x128xf32, #tpu.memory_space<vmem>>, vector<2x128xf32>
    tpu.vector_store %arg6[%c0_6, %c0_7], %7 {strides = array<i32>} : memref<2x128xf32, #tpu.memory_space<vmem>>, vector<2x128xf32>,
    %c0_i32_8 = arith.constant 0 : i32
    %9 = arith.cmpi eq, %arg1, %c0_i32_8 : i32
    %10 = arith.extui %9 : i1 to i32
    %c0_i32_9 = arith.constant 0 : i32
    %11 = arith.cmpi ne, %10, %c0_i32_9 : i32
    scf.if %11 {
      %c0_10 = arith.constant 0 : index
      %c0_11 = arith.constant 0 : index
      %12 = vector.load %arg6[%c0_10, %c0_11] : memref<2x128xf32, #tpu.memory_space<vmem>>, vector<2x128xf32>
      %c0_12 = arith.constant 0 : index
      %c0_13 = arith.constant 0 : index
      %13 = vector.load %arg4[%c0_12, %c0_13] : memref<1x128xf32, #tpu.memory_space<vmem>>, vector<1x128xf32>
      %14 = vector.broadcast %13 : vector<1x128xf32> to vector<2x128xf32>
      %15 = arith.addf %12, %14 : vector<2x128xf32>
      %c0_14 = arith.constant 0 : index
      %c0_15 = arith.constant 0 : index
      %16 = vector.load %arg5[%c0_14, %c0_15] : memref<2x128xf32, #tpu.memory_space<vmem>>, vector<2x128xf32>
      tpu.vector_store %arg5[%c0_14, %c0_15], %15 {strides = array<i32>} : memref<2x128xf32, #tpu.memory_space<vmem>>, vector<2x128xf32>,
    } else {
    }
    return
  }
  func.func @transform_0(%arg0: i32, %arg1: i32) -> (i32, i32) {
    %c0_i32 = arith.constant 0 : i32
    return %arg0, %arg1 : i32, i32
  }
  func.func @transform_1(%arg0: i32, %arg1: i32) -> (i32, i32) {
    %c0_i32 = arith.constant 0 : i32
    %c0_i32_0 = arith.constant 0 : i32
    return %arg1, %c0_i32 : i32, i32
  }
  func.func @transform_2(%arg0: i32, %arg1: i32) -> (i32, i32) {
    %c0_i32 = arith.constant 0 : i32
    %c0_i32_0 = arith.constant 0 : i32
    %c0_i32_1 = arith.constant 0 : i32
    return %c0_i32, %c0_i32_0 : i32, i32
  }
  func.func @transform_3(%arg0: i32, %arg1: i32) -> (i32, i32) {
    %c0_i32 = arith.constant 0 : i32
    %c0_i32_0 = arith.constant 0 : i32
    return %arg0, %c0_i32 : i32, i32
  }
}

</mosaic_0001>

<bundles_post_ra>
// kernel: tpu_custom_call.1
= control target key start
LH: loop header
LB: loop body
LE: loop exit
PB: predicated region body
PF: predicated region fallthrough
CT: control target
= control target key end

     0   :  { %8 = vsyncpa [#allocation4], 0  ;;  %s234_s0 = inlined_call_operand.hbm [shape: f32[2,32], index: 0, kind: input, shape index: {}]   ;;  %s235_s1 = inlined_call_operand.hbm [shape: f32[32,128], index: 1, kind: input, shape index: {}]   ;;  %s236_s2 = inlined_call_operand.vmem [shape: f32[1,128], index: 2, kind: input, shape index: {}]   ;;  %s237_s3 = inlined_call_operand.hbm [shape: f32[2,128], index: 3, kind: output, shape index: {}]  }
   0x1   :  { %9 = vsyncpa [#allocation7], 0 }
   0x2   :  { %10 = vsyncpa [#allocation5], 0  ;;  %s16_s14 = sshll.u32 %s234_s0, 4  ;;  %s196_s15 = smov [#allocation3]   ;;  %s17_s14 = int_to_ptr.hbm [resolvable:$true] %s16_s14 }
   0x3   :  { %s18_s16 = sshll.u32 %s196_s15, 4  ;;  %s26_s19 = sshll.u32 %s235_s1, 4  ;;  %s19_s16 = int_to_ptr.vmem [resolvable:$true] %s18_s16  ;;  %s27_s19 = int_to_ptr.hbm [resolvable:$true] %s26_s19 }
   0x4   :  { %21 = dma.hbm_to_vmem [thread:$0]  %s17_s14, 32, %s19_s16, [#allocation4]  }
   0x5   :  { %s197_s20 = smov [#allocation6]   ;;  %s198_s22 = smov 128  }
   0x6   :  { %s28_s21 = sshll.u32 %s197_s20, 4  ;;  %s199_s23 = smov 8   ;;  %s29_s21 = int_to_ptr.vmem [resolvable:$true] %s28_s21 }
   0x7   :  { %34 = dma.hbm_to_vmem [thread:$0]  %s27_s19, 512, %s29_s21, [#allocation7], %s198_s22, %s198_s22, %s199_s23  }
   0x8   :  { %190 = dma.done.wait [#allocation4], 32  }
   0x9   :  { %191 = vsyncadd [#allocation4], 4294967264 }
   0xa   :  { %192 = dma.done.wait [#allocation7], 512  }
   0xb   :  { %193 = vsyncadd [#allocation7], 4294966784  ;;  %v200_v0 = vmov 0.0   ;;  %v55_v1 = vld [vmem:[#allocation6 + $0x18] sm:$0xff]  ;;  %v54_v2 = vld [vmem:[#allocation6 + $0x10] sm:$0xff]  ;;  %vm56_vm0 = vcmask 261120  }
   0xc   :  { %49 = vst [vmem:[#allocation2] sm:$0x3] %v200_v0  ;;  %72 = vmatpush.msra.mxu0 %v55_v1  ;;  %v53_v3 = vld [vmem:[#allocation6 + $0x8] sm:$0xff]  ;;  %v52_v4 = vld [vmem:[#allocation6] sm:$0xff]  ;;  %v51_v5 = vld [vmem:[#allocation3] sm:$0x3] }
   0xd   :  { %v117_v9 = vld [vmem:[%s236_s2] ss:$0 sm:$0xff]  ;;  %s201_s24 = smov [#allocation8]   ;;  %s99_s28 = sshll.u32 %s237_s3, 4  ;;  %s100_s28 = int_to_ptr.hbm [resolvable:$true] %s99_s28 }
   0xe   :  { %73 = vmatpush.msra.mxu0 %v54_v2  ;;  %s97_s25 = sshll.u32 %s201_s24, 4  ;;  %s98_s25 = int_to_ptr.vmem [resolvable:$true] %s97_s25 }
  0x10   :  { %74 = vmatpush.msra.mxu0 %v53_v3 }
  0x12   :  { %75 = vmatpush.msra.mxu0 %v52_v4 }
  0x13   :  { %110 = vmatmul.msk.f32.vlgmr.msra.gmra.mxu0 %vm56_vm0, %v51_v5  ;;  %v50_v6 = vld [vmem:[#allocation2] sm:$0x3] }
  0x90   :  { %v77_v7 = vpop.f32.mrf.mxu0 }
  0x91   :  { %v80_v8 = vadd.f32 %v77_v7, %v50_v6 }
  0x93   :  { %81 = vst [vmem:[#allocation2] sm:$0x3] %v80_v8 }
  0x9a   :  { %v85_v10 = vld [vmem:[#allocation2] sm:$0x3] }
  0x9b   :  { %v90_v11 = vadd.f32 %v117_v9, %v85_v10 }
  0x9d   :  { %91 = vst [vmem:[#allocation8] sm:$0x3] %v90_v11 }
  0x9e   :  { %102 = dma.vmem_to_hbm [thread:$0]  %s98_s25, 32, %s100_s28, [#allocation5]  }
  0x9f   :  { %194 = dma.done.wait [#allocation5], 32  }
  0xa0   :  { %195 = vsyncadd [#allocation5], 4294967264 }
  0xa1   :  { %107 = vsyncpa [#allocation4], 1 }
  0xa2   :  { %108 = vsyncpa [#allocation7], 1 }
  0xa3   :  { %109 = vsyncpa [#allocation5], 1 }

</bundles_post_ra>
